<compile_context>
chip_gen: v7x
topology: tpu7x:2x2x1
jax: 0.10.0
libtpu: 0.0.40
codegen_flags: <defaults>
</compile_context>

<pallas_src>
import functools

import jax
import jax.numpy as jnp
from jax.experimental import pallas as pl
from jax.experimental.pallas import tpu as pltpu


def _round_up(x, m):
    return ((x + m - 1) // m) * m


def packed_affine_kernel(x_ref, w_ref, b_ref, o_ref):
    # One full-depth MXU push per batch tile: (tile_g, 128) @ (128, pack*out) with
    # f32 accumulation, then a broadcast bias add (VPU has slack), store real width.
    o_ref[...] = (
        jnp.dot(x_ref[...], w_ref[...], preferred_element_type=jnp.float32)
        + b_ref[...]
    ).astype(o_ref.dtype)


def prepare_params(params):
    """One-time fold of the three activation-free Linear layers into a single
    MXU-friendly block-diagonal affine.

    params: (w1, b1, w2, b2, w3, b3), weights already (in_dim, out_dim), biases (1, out).
    Returns (w_block, b_block):
      w_block: (pack*in, pack*out) = kron(I_pack, W1@W2@W3), pack = 128 // in  (full MXU depth)
      b_block: (1, pack*out)       = ((b1@W2)+b2)@W3 + b3, tiled pack times.
    """
    w1, b1, w2, b2, w3, b3 = params
    in_features = w1.shape[0]

    w_eff = (w1 @ w2) @ w3                      # (in, out)
    b_eff = ((b1 @ w2) + b2) @ w3 + b3          # (1, out)

    pack = 128 // in_features if 128 % in_features == 0 else 1
    w_block = jnp.kron(jnp.eye(pack, dtype=w_eff.dtype), w_eff)   # (pack*in, pack*out)
    b_block = jnp.tile(b_eff, (1, pack))                          # (1, pack*out)
    return w_block, b_block


@functools.partial(jax.jit, static_argnames=("tile_b",))
def multiclass_forward(x, w_block, b_block, *, tile_b=8192):
    """Forward pass of MultiClassModel.layer_stack as one fused Pallas kernel.

    x: (B, in_features) f32.  (w_block, b_block) from prepare_params().
    tile_b: batch-tile size in sample rows (static).
    """
    B, in_features = x.shape
    k_pack = w_block.shape[0]                 # pack * in_features  (128 here)
    pack = k_pack // in_features
    n_pack = w_block.shape[1]                 # pack * out_features (96 here)
    out_features = n_pack // pack

    # Pad only the remainder rows (<= pack-1) so the 32-sample packing reshape is a
    # pure metadata reinterpretation of the contiguous row-major buffer.
    rem = B % pack
    if rem:
        x = jnp.pad(x, ((0, pack - rem), (0, 0)))
    bp = x.shape[0]
    g = bp // pack
    xg = x.reshape(g, k_pack)                 # (G, 128): free row-major reshape

    # Tile over packed rows; keep the second-minor block dim a multiple of 8.
    tile_g = max(8, _round_up(tile_b, 8 * pack) // pack)
    # v7x megacore: prefer >= 2 tiles along the "parallel" batch axis.
    tile_g = min(tile_g, _round_up(pl.cdiv(g, 2), 8))
    if tile_g >= g:
        tile_g = g                            # single tile: block == full array (legal)
    grid = (pl.cdiv(g, tile_g),)              # ragged last tile handled by Pallas masking

    out = pl.pallas_call(
        packed_affine_kernel,
        out_shape=jax.ShapeDtypeStruct((g, n_pack), x.dtype),
        grid_spec=pltpu.PrefetchScalarGridSpec(
            num_scalar_prefetch=0,
            grid=grid,
            in_specs=[
                pl.BlockSpec((tile_g, k_pack), lambda i: (i, 0)),   # packed x tile
                pl.BlockSpec((k_pack, n_pack), lambda i: (0, 0)),   # W_block (resident)
                pl.BlockSpec((1, n_pack), lambda i: (0, 0)),        # b_block (resident)
            ],
            out_specs=pl.BlockSpec((tile_g, n_pack), lambda i: (i, 0)),
        ),
        compiler_params=pltpu.CompilerParams(
            dimension_semantics=("parallel",),   # v7x: shard batch tiles across 2 TCs
        ),
    )(xg, w_block, b_block)

    logits = out.reshape(bp, out_features)     # (G, pack*out) -> (Bp, out): metadata only
    return logits[:B] if rem else logits


def init_params(key, in_features, out_features, hidden_nodes=8):
    """Deterministic init mimicking nn.Linear's U(-1/sqrt(fan_in), 1/sqrt(fan_in)).

    Weights returned pre-transposed to (in_dim, out_dim); biases as (1, out) rows."""
    keys = jax.random.split(key, 6)

    def linear_init(kw, kb, fan_in, fan_out):
        bound = 1.0 / jnp.sqrt(fan_in)
        w = jax.random.uniform(kw, (fan_in, fan_out), jnp.float32, -bound, bound)
        b = jax.random.uniform(kb, (1, fan_out), jnp.float32, -bound, bound)
        return w, b

    w1, b1 = linear_init(keys[0], keys[1], in_features, hidden_nodes)
    w2, b2 = linear_init(keys[2], keys[3], hidden_nodes, hidden_nodes)
    w3, b3 = linear_init(keys[4], keys[5], hidden_nodes, out_features)
    return (w1, b1, w2, b2, w3, b3)


def _reference(x, params):
    w1, b1, w2, b2, w3, b3 = params
    return ((x @ w1 + b1) @ w2 + b2) @ w3 + b3


if __name__ == "__main__":
    # Small shapes consistent with the multiclass-classification MLP:
    # 4 input features, hidden=8, 3 output classes.
    IN_FEATURES, HIDDEN, OUT_FEATURES = 4, 8, 3

    key = jax.random.PRNGKey(0)
    k_x1, k_x2, k_p = jax.random.split(key, 3)
    params = init_params(k_p, IN_FEATURES, OUT_FEATURES, HIDDEN)
    w_block, b_block = prepare_params(params)   # one-time parameter fold

    # Case 1: tiny batch (B=8) -> single packed group, single tile.
    x_small = jax.random.normal(k_x1, (8, IN_FEATURES), dtype=jnp.float32)
    out_small = jax.block_until_ready(multiclass_forward(x_small, w_block, b_block))
    ref_small = _reference(x_small, params)
    assert out_small.shape == (8, OUT_FEATURES), out_small.shape
    assert jnp.allclose(out_small, ref_small, atol=1e-4, rtol=1e-4), float(
        jnp.max(jnp.abs(out_small - ref_small))
    )

    # Case 2: ragged batch (B=300) -> remainder-row padding, 2 grid tiles, masked last tile.
    x_big = jax.random.normal(k_x2, (300, IN_FEATURES), dtype=jnp.float32)
    out_big = jax.block_until_ready(multiclass_forward(x_big, w_block, b_block, tile_b=256))
    ref_big = _reference(x_big, params)
    assert out_big.shape == (300, OUT_FEATURES), out_big.shape
    assert jnp.allclose(out_big, ref_big, atol=1e-4, rtol=1e-4), float(
        jnp.max(jnp.abs(out_big - ref_big))
    )

    print("KERNEL_OK")
</pallas_src>

<mosaic_0001>
module attributes {stable_mosaic.version = 11 : i64} {
  func.func @packed_affine_kernel(%arg0: i32, %arg1: memref<1x128xf32, #tpu.memory_space<vmem>>, %arg2: memref<128x96xf32, #tpu.memory_space<vmem>>, %arg3: memref<1x96xf32, #tpu.memory_space<vmem>>, %arg4: memref<1x96xf32, #tpu.memory_space<vmem>>) attributes {dimension_semantics = [#tpu.dimension_semantics<parallel>], iteration_bounds = array<i64: 1>, scalar_prefetch = 0 : i64, scratch_operands = 0 : i64, tpu.core_type = #tpu.core_type<tc>, window_params = [{transform_indices = @transform_0, window_bounds = array<i64: 1, 128>}, {pipeline_mode = #tpu.pipeline_mode<synchronous>, transform_indices = @transform_1, window_bounds = array<i64: 128, 96>}, {pipeline_mode = #tpu.pipeline_mode<synchronous>, transform_indices = @transform_2, window_bounds = array<i64: 1, 96>}, {transform_indices = @transform_3, window_bounds = array<i64: 1, 96>}]} {
    %c0 = arith.constant 0 : index
    %c0_0 = arith.constant 0 : index
    %0 = vector.load %arg1[%c0, %c0_0] : memref<1x128xf32, #tpu.memory_space<vmem>>, vector<1x128xf32>
    %c0_1 = arith.constant 0 : index
    %c0_2 = arith.constant 0 : index
    %1 = vector.load %arg2[%c0_1, %c0_2] : memref<128x96xf32, #tpu.memory_space<vmem>>, vector<128x96xf32>
    %cst = arith.constant dense<0.000000e+00> : vector<1x96xf32>
    %2 = tpu.matmul %0, %1, %cst {dimension_numbers = #tpu.dot_dimension_numbers<[1], [0], [0], [1], [0, 0, 1, 1], [], []>} : vector<1x128xf32>, vector<128x96xf32>, vector<1x96xf32> -> vector<1x96xf32>
    %c0_3 = arith.constant 0 : index
    %c0_4 = arith.constant 0 : index
    %3 = vector.load %arg3[%c0_3, %c0_4] : memref<1x96xf32, #tpu.memory_space<vmem>>, vector<1x96xf32>
    %4 = arith.addf %2, %3 : vector<1x96xf32>
    %c0_5 = arith.constant 0 : index
    %c0_6 = arith.constant 0 : index
    %5 = vector.load %arg4[%c0_5, %c0_6] : memref<1x96xf32, #tpu.memory_space<vmem>>, vector<1x96xf32>
    tpu.vector_store %arg4[%c0_5, %c0_6], %4 {strides = array<i32>} : memref<1x96xf32, #tpu.memory_space<vmem>>, vector<1x96xf32>,
    return
  }
  func.func @transform_0(%arg0: i32) -> (i32, i32) {
    %c0_i32 = arith.constant 0 : i32
    %c0_i32_0 = arith.constant 0 : i32
    return %arg0, %c0_i32 : i32, i32
  }
  func.func @transform_1(%arg0: i32) -> (i32, i32) {
    %c0_i32 = arith.constant 0 : i32
    %c0_i32_0 = arith.constant 0 : i32
    %c0_i32_1 = arith.constant 0 : i32
    return %c0_i32, %c0_i32_0 : i32, i32
  }
  func.func @transform_2(%arg0: i32) -> (i32, i32) {
    %c0_i32 = arith.constant 0 : i32
    %c0_i32_0 = arith.constant 0 : i32
    %c0_i32_1 = arith.constant 0 : i32
    return %c0_i32, %c0_i32_0 : i32, i32
  }
  func.func @transform_3(%arg0: i32) -> (i32, i32) {
    %c0_i32 = arith.constant 0 : i32
    %c0_i32_0 = arith.constant 0 : i32
    return %arg0, %c0_i32 : i32, i32
  }
}

</mosaic_0001>

<bundles_post_ra>
// kernel: multiclass_forward.1
= control target key start
LH: loop header
LB: loop body
LE: loop exit
PB: predicated region body
PF: predicated region fallthrough
CT: control target
= control target key end

     0   :  { %v187_v0 = vmov 0.0|0.0   ;;  %vm188_vm0 = vmmov 0   ;;  %v189_v4 = vmov 0.0   ;;  %vm102_vm1 = vcmask 778240   ;;  %s267_s1 = inlined_call_operand.vmem [shape: f32[128,96], index: 1, kind: input, shape index: {}]   ;;  %s268_s0 = inlined_call_operand.vmem [shape: f32[1,128], index: 0, kind: input, shape index: {}]   ;;  %s269_s2 = inlined_call_operand.vmem [shape: f32[1,96], index: 2, kind: input, shape index: {}]   ;;  %s270_s3 = inlined_call_operand.vmem [shape: f32[1,96], index: 3, kind: output, shape index: {}]  }
   0x1   :  { %160 = vmatprep.subr.bf16.mxu0 %v187_v0  ;;  %v15_v1 = vld [vmem:[%s267_s1] sm:$0xff]  ;;  %v16_v2 = vld [vmem:[%s267_s1 + $0x8] sm:$0xff]  ;;  %v17_v3 = vld [vmem:[%s267_s1 + $0x10] sm:$0xff]  ;;  %157 = vmatprep.mubr.msk.f32.mxu0 %vm188_vm0, %v189_v4 }
   0x2   :  { %v161_v5 = vpack.c.bf16 %v16_v2, %v15_v1  ;;  %v18_v6 = vld [vmem:[%s267_s1 + $0x18] sm:$0xff]  ;;  %v19_v8 = vld [vmem:[%s267_s1 + $0x20] sm:$0xff]  ;;  %v20_v9 = vld [vmem:[%s267_s1 + $0x28] sm:$0xff] }
   0x3   :  { %v164_v7 = vpack.c.bf16 %v18_v6, %v17_v3  ;;  %v167_v10 = vpack.c.bf16 %v20_v9, %v19_v8  ;;  %v21_v11 = vld [vmem:[%s267_s1 + $0x30] sm:$0xff]  ;;  %v22_v12 = vld [vmem:[%s267_s1 + $0x38] sm:$0xff]  ;;  %v23_v14 = vld [vmem:[%s267_s1 + $0x40] sm:$0xff] }
   0x4   :  { %162 = vmatpush3.bf16.msra.mxu0 %v161_v5  ;;  %v170_v13 = vpack.c.bf16 %v22_v12, %v21_v11  ;;  %v24_v15 = vld [vmem:[%s267_s1 + $0x48] sm:$0xff]  ;;  %v25_v17 = vld [vmem:[%s267_s1 + $0x50] sm:$0xff]  ;;  %v26_v18 = vld [vmem:[%s267_s1 + $0x58] sm:$0xff] }
   0x5   :  { %163 = vmatprep.subr.bf16.mxu0 %v187_v0  ;;  %v173_v16 = vpack.c.bf16 %v24_v15, %v23_v14  ;;  %v176_v19 = vpack.c.bf16 %v26_v18, %v25_v17  ;;  %v27_v20 = vld [vmem:[%s267_s1 + $0x60] sm:$0xff]  ;;  %v28_v21 = vld [vmem:[%s267_s1 + $0x68] sm:$0xff]  ;;  %v29_v23 = vld [vmem:[%s267_s1 + $0x70] sm:$0xff] }
   0x6   :  { %v179_v22 = vpack.c.bf16 %v28_v21, %v27_v20  ;;  %v30_v24 = vld [vmem:[%s267_s1 + $0x78] sm:$0xff]  ;;  %v14_v26 = vld [vmem:[%s268_s0] sm:$0x1] }
   0x7   :  { %v182_v25 = vpack.c.bf16 %v30_v24, %v29_v23  ;;  %v31_v27 = vld [vmem:[%s269_s2] sm:$0x1] }
   0x8   :  { %165 = vmatpush3.bf16.msra.mxu0 %v164_v7 }
   0x9   :  { %166 = vmatprep.subr.bf16.mxu0 %v187_v0 }
   0xc   :  { %168 = vmatpush3.bf16.msra.mxu0 %v167_v10 }
   0xd   :  { %169 = vmatprep.subr.bf16.mxu0 %v187_v0 }
  0x10   :  { %171 = vmatpush3.bf16.msra.mxu0 %v170_v13 }
  0x11   :  { %172 = vmatprep.subr.bf16.mxu0 %v187_v0 }
  0x14   :  { %174 = vmatpush3.bf16.msra.mxu0 %v173_v16 }
  0x15   :  { %175 = vmatprep.subr.bf16.mxu0 %v187_v0 }
  0x18   :  { %177 = vmatpush3.bf16.msra.mxu0 %v176_v19 }
  0x19   :  { %178 = vmatprep.subr.bf16.mxu0 %v187_v0 }
  0x1c   :  { %180 = vmatpush3.bf16.msra.mxu0 %v179_v22 }
  0x1d   :  { %181 = vmatprep.subr.bf16.mxu0 %v187_v0 }
  0x20   :  { %183 = vmatpush3.bf16.msra.mxu0 %v182_v25 }
  0x23   :  { %158 = vmatmul.mubr.f32.vlgmr.msra.gmra.mrb[0].mxu0 %v14_v26 }
  0xf6   :  { %v98_v28 = vpop.f32.mrb[0].mxu0 }
  0xf7   :  { %v99_v29 = vadd.f32 %v98_v28, %v31_v27  ;;  %v159_v30 = vpop.f32.mrb[1].mxu0 }
  0xf9   :  { %103 = vst.msk [vmem:[%s270_s3] sm:$0x1] %vm102_vm1, %v99_v29 }

</bundles_post_ra>
